<compile_context>
chip_gen: v6e
topology: v6e:2x2x1
jax: 0.10.0
libtpu: 0.0.40
codegen_flags: <defaults>
</compile_context>

<pallas_src>
import functools

import jax
import jax.numpy as jnp
from jax.experimental import pallas as pl
from jax.experimental.pallas import tpu as pltpu


_NEG_MASK = -1e30  # finite "-inf": LeakyReLU keeps it hugely negative, exp -> 0


def _round_up(x, m):
    return ((x + m - 1) // m) * m


def _vmem_capacity_bytes():
    try:
        return int(pltpu.get_tpu_info().vmem_capacity_bytes)
    except Exception:
        return 64 << 20  # conservative default (v7x per-TensorCore)


def mlp3_kernel(zi_ref, hi_ref, wz_ref, wh_ref, b_ref, o_ref, *, o_valid):
    # Fused concat + linear: cat(Zi, Hi) @ W == Zi @ W[:D1] + Hi @ W[D1:].
    # Activations are cast to the resident weight dtype (f32 normally, bf16
    # when the wrapper chose bf16 residency); accumulation stays f32 (MXU).
    zi = zi_ref[...].astype(wz_ref.dtype)
    hi = hi_ref[...].astype(wh_ref.dtype)
    y = jnp.dot(zi, wz_ref[...], preferred_element_type=jnp.float32)
    y = y + jnp.dot(hi, wh_ref[...], preferred_element_type=jnp.float32)
    y = y + b_ref[...].astype(jnp.float32)   # (TB, O_pad) + (1, O_pad); mask baked in

    # LeakyReLU (negative_slope=0.01): one VALU op instead of compare+select.
    y = jnp.maximum(y, 0.01 * y)

    # Numerically stable softmax over dim=1; padded columns carry ~-1e30 from
    # the bias so exp() underflows to exactly 0.  Reciprocal runs on the EUP.
    m = jnp.max(y, axis=1, keepdims=True)
    e = jnp.exp(y - m)
    s = jnp.sum(e, axis=1, keepdims=True)
    p = e * pl.reciprocal(s, approx=True)

    o_pad = y.shape[1]
    if o_valid != o_pad:
        p = p[:, :o_valid]                    # store only the real columns
    o_ref[...] = p.astype(o_ref.dtype)


def mlp3_prepare_params(w, b, d1, *, weight_dtype=None):
    """One-time parameter prep: split W at d1, lane-pad O, bake the softmax
    padding mask into the bias.  w: (D1+D2, O), b: (O,)."""
    D, O = w.shape
    O_pad = _round_up(max(O, 128), 128)

    if weight_dtype is None:
        # A resident f32 (D, O_pad) weight that fits v5e/v6e's 128 MiB VMEM
        # may not fit v7x's 64 MiB: keep it resident as bf16 in that case
        # (matmuls still accumulate in f32).
        cap = _vmem_capacity_bytes()
        weight_dtype = jnp.bfloat16 if D * O_pad * 4 > cap // 3 else w.dtype
    # TODO(synk): for weights too large even as bf16, tile the reduction axis
    # (grid over D with an f32 VMEM accumulator) instead of full residency.

    wz = w[:d1]
    wh = w[d1:]
    b = b.astype(jnp.float32)
    if O_pad != O:
        wz = jnp.pad(wz, ((0, 0), (0, O_pad - O)))
        wh = jnp.pad(wh, ((0, 0), (0, O_pad - O)))
        # Padded columns get a huge negative bias -> softmax weight exactly 0.
        b = jnp.pad(b, (0, O_pad - O), constant_values=_NEG_MASK)
    wz = wz.astype(weight_dtype)
    wh = wh.astype(weight_dtype)
    b2 = b.reshape(1, O_pad)
    return wz, wh, b2, O


def _pick_batch_tile(d1, d2, o_pad, o_out, in_itemsize, out_itemsize, act_budget):
    # Per batch row: double-buffered Zi/Hi/out blocks plus f32 temporaries for
    # the matmul + softmax epilogue.
    per_row = (2 * (d1 + d2) * in_itemsize
               + 2 * o_out * out_itemsize
               + 6 * o_pad * 4)
    tb = 2048
    while tb > 8 and tb * per_row > act_budget:
        tb //= 2
    return tb                                 # power of two, >= 8


def mlp3_apply(zi, hi, wz, wh, b2, o_valid):
    """zi: (B, D1), hi: (B, D2), wz: (D1, O_pad), wh: (D2, O_pad),
    b2: (1, O_pad) with mask baked in -> (B, o_valid)."""
    B, D1 = zi.shape
    B2, D2 = hi.shape
    assert B == B2
    O_pad = b2.shape[1]
    assert wz.shape == (D1, O_pad) and wh.shape == (D2, O_pad)

    cap = _vmem_capacity_bytes()
    in_itemsize = jnp.dtype(zi.dtype).itemsize
    w_itemsize = jnp.dtype(wz.dtype).itemsize
    out_itemsize = in_itemsize

    weight_bytes = (D1 + D2) * O_pad * w_itemsize + O_pad * 4
    # Generation-aware activation budget: subtract the resident weights from a
    # fraction of physical VMEM (128 MiB on v5e/v6e, 64 MiB on v7x).
    act_budget = max(int(cap * 0.4) - 2 * weight_bytes, 4 << 20)
    tb_max = _pick_batch_tile(D1, D2, O_pad, o_valid, in_itemsize,
                              out_itemsize, act_budget)
    TB = B if B <= tb_max else tb_max         # tb_max is a power of two >= 8
    grid = (pl.cdiv(B, TB),)

    act_bytes = 2 * TB * ((D1 + D2) * in_itemsize + o_valid * out_itemsize)
    vmem_limit = int(1.5 * (2 * weight_bytes + act_bytes)) + (16 << 20)
    vmem_limit = min(max(vmem_limit, 32 << 20), cap * 3 // 4)

    kernel = functools.partial(mlp3_kernel, o_valid=o_valid)
    out_shape = jax.ShapeDtypeStruct((B, o_valid), zi.dtype)
    compiler_params = pltpu.CompilerParams(
        dimension_semantics=("parallel",),    # batch axis splits across TCs
        vmem_limit_bytes=vmem_limit,
    )

    def call(single_buffer_weights):
        # Weights/bias have constant block indices -> one buffer suffices.
        wkw = ({"pipeline_mode": pl.Buffered(1)}
               if single_buffer_weights else {})
        in_specs = [
            pl.BlockSpec((TB, D1), lambda i: (i, 0)),             # Zi
            pl.BlockSpec((TB, D2), lambda i: (i, 0)),             # Hi
            pl.BlockSpec((D1, O_pad), lambda i: (0, 0), **wkw),   # W[:D1]
            pl.BlockSpec((D2, O_pad), lambda i: (0, 0), **wkw),   # W[D1:]
            pl.BlockSpec((1, O_pad), lambda i: (0, 0), **wkw),    # bias+mask
        ]
        out_specs = pl.BlockSpec((TB, o_valid), lambda i: (i, 0))
        return pl.pallas_call(
            kernel,
            out_shape=out_shape,
            grid=grid,
            in_specs=in_specs,
            out_specs=out_specs,
            compiler_params=compiler_params,
        )(zi, hi, wz, wh, b2)

    try:
        return call(True)
    except Exception:
        # Fall back to default double-buffering if this JAX/Mosaic build
        # rejects buffer_count=1 for pipeline_mode.
        return call(False)


def mlp3_forward(zi, hi, w, b):
    """Convenience one-shot wrapper: zi (B, D1), hi (B, D2), w (D1+D2, O),
    b (O,) -> (B, O).  For repeated calls, run mlp3_prepare_params once."""
    wz, wh, b2, O = mlp3_prepare_params(w, b, zi.shape[1])
    return mlp3_apply(zi, hi, wz, wh, b2, O)


if __name__ == "__main__":
    # Small shapes consistent with the forward: Zi (B, D1), Hi (B, D2),
    # input_dim = D1 + D2, output_dim = O.
    B, D1, D2, O = 8, 16, 16, 32
    input_dim = D1 + D2

    key = jax.random.PRNGKey(0)
    k_zi, k_hi, k_w, k_b = jax.random.split(key, 4)

    zi = jax.random.normal(k_zi, (B, D1), dtype=jnp.float32)
    hi = jax.random.normal(k_hi, (B, D2), dtype=jnp.float32)

    # Deterministic init mimicking nn.Linear: U(-1/sqrt(fan_in), 1/sqrt(fan_in)).
    bound = 1.0 / (input_dim ** 0.5)
    w = jax.random.uniform(k_w, (input_dim, O), dtype=jnp.float32,
                           minval=-bound, maxval=bound)
    b = jax.random.uniform(k_b, (O,), dtype=jnp.float32,
                           minval=-bound, maxval=bound)

    # Pad/split parameters once (setup time), then run the kernel.
    wz, wh, b2, o_valid = mlp3_prepare_params(w, b, D1)
    out = mlp3_apply(zi, hi, wz, wh, b2, o_valid)
    jax.block_until_ready(out)

    # Cross-check against a pure-JAX reference of the same math.
    cat = jnp.concatenate([zi, hi], axis=1)
    ref = cat @ w + b
    ref = jnp.where(ref > 0, ref, 0.01 * ref)
    ref = jax.nn.softmax(ref, axis=1)

    assert out.shape == (B, O), out.shape
    assert jnp.allclose(out, ref, atol=1e-3, rtol=1e-3), (
        float(jnp.max(jnp.abs(out - ref))))
    # Rows of a softmax must sum to ~1 (approx reciprocal -> ~1e-4 rel error).
    assert jnp.allclose(jnp.sum(out, axis=1), 1.0, atol=5e-3)

    print("KERNEL_OK")
</pallas_src>

<mosaic_0001>
module attributes {stable_mosaic.version = 11 : i64} {
  func.func @mlp3_kernel(%arg0: i32, %arg1: memref<8x16xf32, #tpu.memory_space<vmem>>, %arg2: memref<8x16xf32, #tpu.memory_space<vmem>>, %arg3: memref<16x128xf32, #tpu.memory_space<vmem>>, %arg4: memref<16x128xf32, #tpu.memory_space<vmem>>, %arg5: memref<1x128xf32, #tpu.memory_space<vmem>>, %arg6: memref<8x32xf32, #tpu.memory_space<vmem>>) attributes {dimension_semantics = [#tpu.dimension_semantics<parallel>], iteration_bounds = array<i64: 1>, scalar_prefetch = 0 : i64, scratch_operands = 0 : i64, tpu.core_type = #tpu.core_type<tc>, window_params = [{transform_indices = @transform_0, window_bounds = array<i64: 8, 16>}, {transform_indices = @transform_1, window_bounds = array<i64: 8, 16>}, {pipeline_mode = #tpu.pipeline_mode<synchronous>, transform_indices = @transform_2, window_bounds = array<i64: 16, 128>}, {pipeline_mode = #tpu.pipeline_mode<synchronous>, transform_indices = @transform_3, window_bounds = array<i64: 16, 128>}, {pipeline_mode = #tpu.pipeline_mode<synchronous>, transform_indices = @transform_4, window_bounds = array<i64: 1, 128>}, {transform_indices = @transform_5, window_bounds = array<i64: 8, 32>}]} {
    %c0 = arith.constant 0 : index
    %c0_0 = arith.constant 0 : index
    %0 = vector.load %arg1[%c0, %c0_0] : memref<8x16xf32, #tpu.memory_space<vmem>>, vector<8x16xf32>
    %c0_1 = arith.constant 0 : index
    %c0_2 = arith.constant 0 : index
    %1 = vector.load %arg2[%c0_1, %c0_2] : memref<8x16xf32, #tpu.memory_space<vmem>>, vector<8x16xf32>
    %c0_3 = arith.constant 0 : index
    %c0_4 = arith.constant 0 : index
    %2 = vector.load %arg3[%c0_3, %c0_4] : memref<16x128xf32, #tpu.memory_space<vmem>>, vector<16x128xf32>
    %cst = arith.constant dense<0.000000e+00> : vector<8x128xf32>
    %3 = tpu.matmul %0, %2, %cst {dimension_numbers = #tpu.dot_dimension_numbers<[1], [0], [0], [1], [0, 0, 1, 1], [], []>} : vector<8x16xf32>, vector<16x128xf32>, vector<8x128xf32> -> vector<8x128xf32>
    %c0_5 = arith.constant 0 : index
    %c0_6 = arith.constant 0 : index
    %4 = vector.load %arg4[%c0_5, %c0_6] : memref<16x128xf32, #tpu.memory_space<vmem>>, vector<16x128xf32>
    %cst_7 = arith.constant dense<0.000000e+00> : vector<8x128xf32>
    %5 = tpu.matmul %1, %4, %cst_7 {dimension_numbers = #tpu.dot_dimension_numbers<[1], [0], [0], [1], [0, 0, 1, 1], [], []>} : vector<8x16xf32>, vector<16x128xf32>, vector<8x128xf32> -> vector<8x128xf32>
    %6 = arith.addf %3, %5 : vector<8x128xf32>
    %c0_8 = arith.constant 0 : index
    %c0_9 = arith.constant 0 : index
    %7 = vector.load %arg5[%c0_8, %c0_9] : memref<1x128xf32, #tpu.memory_space<vmem>>, vector<1x128xf32>
    %8 = vector.broadcast %7 : vector<1x128xf32> to vector<8x128xf32>
    %9 = arith.addf %6, %8 : vector<8x128xf32>
    %cst_10 = arith.constant 0.00999999977 : f32
    %10 = vector.broadcast %cst_10 : f32 to vector<8x128xf32>
    %11 = arith.mulf %10, %9 : vector<8x128xf32>
    %12 = arith.maximumf %9, %11 : vector<8x128xf32>
    %cst_11 = arith.constant dense<0xFF800000> : vector<8xf32>
    %13 = vector.multi_reduction <maximumf>, %12, %cst_11 [1] : vector<8x128xf32> to vector<8xf32>
    %14 = vector.shape_cast %13 : vector<8xf32> to vector<8x1xf32>
    %15 = vector.broadcast %14 : vector<8x1xf32> to vector<8x128xf32>
    %16 = arith.subf %12, %15 : vector<8x128xf32>
    %17 = math.exp %16 : vector<8x128xf32>
    %cst_12 = arith.constant dense<0.000000e+00> : vector<8xf32>
    %18 = vector.multi_reduction <add>, %17, %cst_12 [1] : vector<8x128xf32> to vector<8xf32>
    %19 = vector.shape_cast %18 : vector<8xf32> to vector<8x1xf32>
    %20 = tpu.reciprocal %19 {approx = true} : vector<8x1xf32> -> vector<8x1xf32>
    %21 = vector.broadcast %20 : vector<8x1xf32> to vector<8x128xf32>
    %22 = arith.mulf %17, %21 : vector<8x128xf32>
    %23 = vector.extract_strided_slice %22 {offsets = [0, 0], sizes = [8, 32], strides = [1, 1]} : vector<8x128xf32> to vector<8x32xf32>
    %c0_13 = arith.constant 0 : index
    %c0_14 = arith.constant 0 : index
    %24 = vector.load %arg6[%c0_13, %c0_14] : memref<8x32xf32, #tpu.memory_space<vmem>>, vector<8x32xf32>
    tpu.vector_store %arg6[%c0_13, %c0_14], %23 {strides = array<i32>} : memref<8x32xf32, #tpu.memory_space<vmem>>, vector<8x32xf32>,
    return
  }
  func.func @transform_0(%arg0: i32) -> (i32, i32) {
    %c0_i32 = arith.constant 0 : i32
    %c0_i32_0 = arith.constant 0 : i32
    return %arg0, %c0_i32 : i32, i32
  }
  func.func @transform_1(%arg0: i32) -> (i32, i32) {
    %c0_i32 = arith.constant 0 : i32
    %c0_i32_0 = arith.constant 0 : i32
    return %arg0, %c0_i32 : i32, i32
  }
  func.func @transform_2(%arg0: i32) -> (i32, i32) {
    %c0_i32 = arith.constant 0 : i32
    %c0_i32_0 = arith.constant 0 : i32
    %c0_i32_1 = arith.constant 0 : i32
    return %c0_i32, %c0_i32_0 : i32, i32
  }
  func.func @transform_3(%arg0: i32) -> (i32, i32) {
    %c0_i32 = arith.constant 0 : i32
    %c0_i32_0 = arith.constant 0 : i32
    %c0_i32_1 = arith.constant 0 : i32
    return %c0_i32, %c0_i32_0 : i32, i32
  }
  func.func @transform_4(%arg0: i32) -> (i32, i32) {
    %c0_i32 = arith.constant 0 : i32
    %c0_i32_0 = arith.constant 0 : i32
    %c0_i32_1 = arith.constant 0 : i32
    return %c0_i32, %c0_i32_0 : i32, i32
  }
  func.func @transform_5(%arg0: i32) -> (i32, i32) {
    %c0_i32 = arith.constant 0 : i32
    %c0_i32_0 = arith.constant 0 : i32
    return %arg0, %c0_i32 : i32, i32
  }
}

module attributes {stable_mosaic.version = 11 : i64} {
  func.func @mlp3_kernel(%arg0: i32, %arg1: memref<8x16xf32, #tpu.memory_space<vmem>>, %arg2: memref<8x16xf32, #tpu.memory_space<vmem>>, %arg3: memref<16x128xf32, #tpu.memory_space<vmem>>, %arg4: memref<16x128xf32, #tpu.memory_space<vmem>>, %arg5: memref<1x128xf32, #tpu.memory_space<vmem>>, %arg6: memref<8x32xf32, #tpu.memory_space<vmem>>) attributes {dimension_semantics = [#tpu.dimension_semantics<parallel>], iteration_bounds = array<i64: 1>, scalar_prefetch = 0 : i64, scratch_operands = 0 : i64, tpu.core_type = #tpu.core_type<tc>, window_params = [{transform_indices = @transform_0, window_bounds = array<i64: 8, 16>}, {transform_indices = @transform_1, window_bounds = array<i64: 8, 16>}, {pipeline_mode = #tpu.pipeline_mode<synchronous>, transform_indices = @transform_2, window_bounds = array<i64: 16, 128>}, {pipeline_mode = #tpu.pipeline_mode<synchronous>, transform_indices = @transform_3, window_bounds = array<i64: 16, 128>}, {pipeline_mode = #tpu.pipeline_mode<synchronous>, transform_indices = @transform_4, window_bounds = array<i64: 1, 128>}, {transform_indices = @transform_5, window_bounds = array<i64: 8, 32>}]} {
    %c0 = arith.constant 0 : index
    %c0_0 = arith.constant 0 : index
    %0 = vector.load %arg1[%c0, %c0_0] : memref<8x16xf32, #tpu.memory_space<vmem>>, vector<8x16xf32>
    %c0_1 = arith.constant 0 : index
    %c0_2 = arith.constant 0 : index
    %1 = vector.load %arg2[%c0_1, %c0_2] : memref<8x16xf32, #tpu.memory_space<vmem>>, vector<8x16xf32>
    %c0_3 = arith.constant 0 : index
    %c0_4 = arith.constant 0 : index
    %2 = vector.load %arg3[%c0_3, %c0_4] : memref<16x128xf32, #tpu.memory_space<vmem>>, vector<16x128xf32>
    %cst = arith.constant dense<0.000000e+00> : vector<8x128xf32>
    %3 = tpu.matmul %0, %2, %cst {dimension_numbers = #tpu.dot_dimension_numbers<[1], [0], [0], [1], [0, 0, 1, 1], [], []>} : vector<8x16xf32>, vector<16x128xf32>, vector<8x128xf32> -> vector<8x128xf32>
    %c0_5 = arith.constant 0 : index
    %c0_6 = arith.constant 0 : index
    %4 = vector.load %arg4[%c0_5, %c0_6] : memref<16x128xf32, #tpu.memory_space<vmem>>, vector<16x128xf32>
    %cst_7 = arith.constant dense<0.000000e+00> : vector<8x128xf32>
    %5 = tpu.matmul %1, %4, %cst_7 {dimension_numbers = #tpu.dot_dimension_numbers<[1], [0], [0], [1], [0, 0, 1, 1], [], []>} : vector<8x16xf32>, vector<16x128xf32>, vector<8x128xf32> -> vector<8x128xf32>
    %6 = arith.addf %3, %5 : vector<8x128xf32>
    %c0_8 = arith.constant 0 : index
    %c0_9 = arith.constant 0 : index
    %7 = vector.load %arg5[%c0_8, %c0_9] : memref<1x128xf32, #tpu.memory_space<vmem>>, vector<1x128xf32>
    %8 = vector.broadcast %7 : vector<1x128xf32> to vector<8x128xf32>
    %9 = arith.addf %6, %8 : vector<8x128xf32>
    %cst_10 = arith.constant 0.00999999977 : f32
    %10 = vector.broadcast %cst_10 : f32 to vector<8x128xf32>
    %11 = arith.mulf %10, %9 : vector<8x128xf32>
    %12 = arith.maximumf %9, %11 : vector<8x128xf32>
    %cst_11 = arith.constant dense<0xFF800000> : vector<8xf32>
    %13 = vector.multi_reduction <maximumf>, %12, %cst_11 [1] : vector<8x128xf32> to vector<8xf32>
    %14 = vector.shape_cast %13 : vector<8xf32> to vector<8x1xf32>
    %15 = vector.broadcast %14 : vector<8x1xf32> to vector<8x128xf32>
    %16 = arith.subf %12, %15 : vector<8x128xf32>
    %17 = math.exp %16 : vector<8x128xf32>
    %cst_12 = arith.constant dense<0.000000e+00> : vector<8xf32>
    %18 = vector.multi_reduction <add>, %17, %cst_12 [1] : vector<8x128xf32> to vector<8xf32>
    %19 = vector.shape_cast %18 : vector<8xf32> to vector<8x1xf32>
    %20 = tpu.reciprocal %19 {approx = true} : vector<8x1xf32> -> vector<8x1xf32>
    %21 = vector.broadcast %20 : vector<8x1xf32> to vector<8x128xf32>
    %22 = arith.mulf %17, %21 : vector<8x128xf32>
    %23 = vector.extract_strided_slice %22 {offsets = [0, 0], sizes = [8, 32], strides = [1, 1]} : vector<8x128xf32> to vector<8x32xf32>
    %c0_13 = arith.constant 0 : index
    %c0_14 = arith.constant 0 : index
    %24 = vector.load %arg6[%c0_13, %c0_14] : memref<8x32xf32, #tpu.memory_space<vmem>>, vector<8x32xf32>
    tpu.vector_store %arg6[%c0_13, %c0_14], %23 {strides = array<i32>} : memref<8x32xf32, #tpu.memory_space<vmem>>, vector<8x32xf32>,
    return
  }
  func.func @transform_0(%arg0: i32) -> (i32, i32) {
    %c0_i32 = arith.constant 0 : i32
    %c0_i32_0 = arith.constant 0 : i32
    return %arg0, %c0_i32 : i32, i32
  }
  func.func @transform_1(%arg0: i32) -> (i32, i32) {
    %c0_i32 = arith.constant 0 : i32
    %c0_i32_0 = arith.constant 0 : i32
    return %arg0, %c0_i32 : i32, i32
  }
  func.func @transform_2(%arg0: i32) -> (i32, i32) {
    %c0_i32 = arith.constant 0 : i32
    %c0_i32_0 = arith.constant 0 : i32
    %c0_i32_1 = arith.constant 0 : i32
    return %c0_i32, %c0_i32_0 : i32, i32
  }
  func.func @transform_3(%arg0: i32) -> (i32, i32) {
    %c0_i32 = arith.constant 0 : i32
    %c0_i32_0 = arith.constant 0 : i32
    %c0_i32_1 = arith.constant 0 : i32
    return %c0_i32, %c0_i32_0 : i32, i32
  }
  func.func @transform_4(%arg0: i32) -> (i32, i32) {
    %c0_i32 = arith.constant 0 : i32
    %c0_i32_0 = arith.constant 0 : i32
    %c0_i32_1 = arith.constant 0 : i32
    return %c0_i32, %c0_i32_0 : i32, i32
  }
  func.func @transform_5(%arg0: i32) -> (i32, i32) {
    %c0_i32 = arith.constant 0 : i32
    %c0_i32_0 = arith.constant 0 : i32
    return %arg0, %c0_i32 : i32, i32
  }
}

</mosaic_0001>

<bundles_post_ra>
// kernel: tpu_custom_call.1
= control target key start
LH: loop header
LB: loop body
LE: loop exit
PB: predicated region body
PF: predicated region fallthrough
CT: control target
= control target key end

     0   :  { %10 = vsyncpa [#allocation3], 0  ;;  %s464_s0 = inlined_call_operand.hbm [shape: f32[8,16], index: 0, kind: input, shape index: {}]   ;;  %s465_s1 = inlined_call_operand.hbm [shape: f32[8,16], index: 1, kind: input, shape index: {}]   ;;  %s466_s2 = inlined_call_operand.hbm [shape: f32[16,128], index: 2, kind: input, shape index: {}]   ;;  %s467_s3 = inlined_call_operand.hbm [shape: f32[16,128], index: 3, kind: input, shape index: {}]   ;;  %s468_s4 = inlined_call_operand.vmem [shape: f32[1,128], index: 4, kind: input, shape index: {}]   ;;  %s469_s5 = inlined_call_operand.hbm [shape: f32[8,32], index: 5, kind: output, shape index: {}]  }
   0x1   :  { %11 = vsyncpa [#allocation6], 0 }
   0x2   :  { %12 = vsyncpa [#allocation9], 0 }
   0x3   :  { %13 = vsyncpa [#allocation4], 0  ;;  %s407_s18 = smov [#allocation5]   ;;  %s408_s20 = smov [#allocation2]  }
   0x4   :  { %s30_s19 = sshll.u32 %s407_s18, 4  ;;  %s20_s21 = sshll.u32 %s408_s20, 4  ;;  %s31_s19 = int_to_ptr.vmem [resolvable:$true] %s30_s19  ;;  %s21_s21 = int_to_ptr.vmem [resolvable:$true] %s20_s21 }
   0x5   :  { %s307_s22 = scalar_lea.vmem %s31_s19, 128  ;;  %p312_p1 = scmp.lt.s32.totalorder %s31_s19, %s31_s19 }
   0x6   :  { %p308_p0 = scmp.ne.s32.totalorder %s31_s19, %s307_s22  ;;  %p313_p2 = scmp.lt.s32.totalorder %s307_s22, %s307_s22 }
   0x8   :  { %p314_p3 = por %p313_p2, %p312_p1 }
   0xa   :  { %p315_p4 = pnand %p314_p3, %p308_p0 }
   0xc   :  { %318 = shalt.err (!%p315_p4)
}
   0xd   :  { %33 = dma.hbm_to_vmem [thread:$0]  %s465_s1, 128, %s31_s19, [#allocation6]  }
   0xe   :  { %s327_s25 = scalar_lea.vmem %s21_s21, 128  ;;  %p332_p6 = scmp.lt.s32.totalorder %s21_s21, %s21_s21 }
   0xf   :  { %p328_p5 = scmp.ne.s32.totalorder %s21_s21, %s327_s25  ;;  %p333_p7 = scmp.lt.s32.totalorder %s327_s25, %s327_s25 }
  0x11   :  { %p334_p8 = por %p333_p7, %p332_p6 }
  0x13   :  { %p335_p9 = pnand %p334_p8, %p328_p5 }
  0x15   :  { %338 = shalt.err (!%p335_p9)
}
  0x16   :  { %23 = dma.hbm_to_vmem [thread:$0]  %s464_s0, 128, %s21_s21, [#allocation3]  }
  0x17   :  { %s409_s28 = smov [#allocation7]  }
  0x18   :  { %s39_s29 = sshll.u32 %s409_s28, 4  ;;  %s40_s29 = int_to_ptr.vmem [resolvable:$true] %s39_s29 }
  0x19   :  { %s347_s30 = scalar_lea.vmem %s40_s29, 256  ;;  %p352_p11 = scmp.lt.s32.totalorder %s40_s29, %s40_s29 }
  0x1a   :  { %p348_p10 = scmp.ne.s32.totalorder %s40_s29, %s347_s30  ;;  %p353_p12 = scmp.lt.s32.totalorder %s347_s30, %s347_s30 }
  0x1c   :  { %p354_p13 = por %p353_p12, %p352_p11 }
  0x1e   :  { %p355_p0 = pnand %p354_p13, %p348_p10 }
  0x20   :  { %358 = shalt.err (!%p355_p0)
}
  0x21   :  { %s410_s1 = smov 128   ;;  %s411_s6 = smov 8  }
  0x22   :  { %45 = dma.hbm_to_vmem [thread:$0]  %s466_s2, 256, %s40_s29, [#allocation6], %s410_s1, %s410_s1, %s411_s6  }
  0x23   :  { %s412_s9 = smov [#allocation8]  }
  0x24   :  { %s51_s10 = sshll.u32 %s412_s9, 4  ;;  %s52_s10 = int_to_ptr.vmem [resolvable:$true] %s51_s10 }
  0x25   :  { %s367_s0 = scalar_lea.vmem %s52_s10, 256  ;;  %p372_p2 = scmp.lt.s32.totalorder %s52_s10, %s52_s10 }
  0x26   :  { %p368_p1 = scmp.ne.s32.totalorder %s52_s10, %s367_s0  ;;  %p373_p3 = scmp.lt.s32.totalorder %s367_s0, %s367_s0 }
  0x28   :  { %p374_p4 = por %p373_p3, %p372_p2 }
  0x2a   :  { %p375_p5 = pnand %p374_p4, %p368_p1 }
  0x2c   :  { %378 = shalt.err (!%p375_p5)
}
  0x2d   :  { %57 = dma.hbm_to_vmem [thread:$0]  %s467_s3, 256, %s52_s10, [#allocation9], %s410_s1, %s410_s1, %s411_s6  }
  0x2e   :  { %399 = dma.done.wait [#allocation3], 128  }
  0x2f   :  { %400 = vsyncadd [#allocation3], 4294967168 }
  0x30   :  { %401 = dma.done.wait [#allocation6], 384  }
  0x31   :  { %402 = vsyncadd [#allocation6], 4294966912 }
  0x32   :  { %403 = dma.done.wait [#allocation9], 256  }
  0x33   :  { %404 = vsyncadd [#allocation9], 4294967040  ;;  %v413_v0 = vmov 0.0   ;;  %vm414_vm0 = vmmov 0   ;;  %v77_v1 = vld [vmem:[#allocation8 + $0x8] sm:$0xff]  ;;  %v75_v2 = vld [vmem:[#allocation7 + $0x8] sm:$0xff] }
  0x34   :  { %272 = vmatprep.subr.mxu0 %v413_v0  ;;  %279 = vmatprep.subr.mxu1 %v413_v0  ;;  %v76_v3 = vld [vmem:[#allocation8] sm:$0xff]  ;;  %v74_v4 = vld [vmem:[#allocation7] sm:$0xff]  ;;  %v73_v5 = vld [vmem:[#allocation5] sm:$0xff]  ;;  %vm78_vm1 = vcmask 130048   ;;  %s415_s13 = smov [#allocation10]   ;;  %vm244_vm2 = vcmask 261120  }
  0x35   :  { %276 = vmatprep.mubr.msk.f32.mxu0 %vm414_vm0, %v413_v0  ;;  %283 = vmatprep.mubr.msk.f32.mxu1 %vm414_vm0, %v413_v0  ;;  %v72_v6 = vld [vmem:[#allocation2] sm:$0xff]  ;;  %s252_s14 = sshll.u32 %s415_s13, 4  ;;  %s253_s14 = int_to_ptr.vmem [resolvable:$true] %s252_s14 }
  0x36   :  { %273 = vmatpush3.msra.mxu0 %v77_v1  ;;  %280 = vmatpush3.msra.mxu1 %v75_v2  ;;  %v265_v9 = vld [vmem:[%s468_s4] ss:$0 sm:$0xff]  ;;  %s379_s4 = scalar_lea.vmem %s253_s14, 128  ;;  %p384_p7 = scmp.lt.s32.totalorder %s253_s14, %s253_s14 }
  0x37   :  { %274 = vmatprep.subr.mxu0 %v413_v0  ;;  %281 = vmatprep.subr.mxu1 %v413_v0  ;;  %p380_p6 = scmp.ne.s32.totalorder %s253_s14, %s379_s4  ;;  %p385_p8 = scmp.lt.s32.totalorder %s379_s4, %s379_s4 }
  0x38   :  { %275 = vmatpush3.msra.mxu0 %v76_v3  ;;  %282 = vmatpush3.msra.mxu1 %v74_v4 }
  0x39   :  { %277 = vmatmul.mubr.msk.f32.vlgmr.msra.gmra.mxu0 %vm78_vm1, %v73_v5  ;;  %284 = vmatmul.mubr.msk.f32.vlgmr.msra.gmra.mxu1 %vm78_vm1, %v72_v6  ;;  %p386_p9 = por %p385_p8, %p384_p7 }
  0x3b   :  { %p387_p10 = pnand %p386_p9, %p380_p6 }
  0xf9   :  { %v148_v7 = vpop.f32.mrf.mxu0  ;;  %v221_v8 = vpop.f32.mrf.mxu1 }
  0xfa   :  { %v222_v10 = vadd.f32 %v221_v8, %v148_v7 }
  0xfb   :  { %v278_v11 = vpop.f32.mrf.mxu0  ;;  %v285_v12 = vpop.f32.mrf.mxu1 }
  0xfc   :  { %v232_v13 = vadd.f32 %v265_v9, %v222_v10 }
  0xfe   :  { %v233_v14 = vmul.f32 0.01, %v232_v13 }
 0x100   :  { %v234_v15 = vmax.f32 %v232_v13, %v233_v14 }
 0x102   :  { %235 = vmax.xlane.f32.xlu0 %v234_v15 }
 0x18b   :  { %v236_v16 = vpop.xlane.xlu0 %235 }
 0x18c   :  { %v237_v17 = vsub.f32 %v234_v15, %v236_v16 }
 0x18e   :  { %v238_v18 = vmul.f32 1.442695, %v237_v17 }
 0x190   :  { %295 = vpow2.f32 %v238_v18 }
 0x19d   :  { %v296_v19 = vpop.eup %295 }
 0x19e   :  { %240 = vadd.xlane.f32.xlu0 %v296_v19 }
 0x227   :  { %v241_v20 = vpop.xlane.xlu0 %240 }
 0x228   :  { %297 = vrcp.f32 %v241_v20 }
 0x235   :  { %v298_v21 = vpop.eup %297 }
 0x236   :  { %v243_v22 = vmul.f32 %v298_v21, %v296_v19 }
 0x238   :  { %245 = vst.msk [vmem:[#allocation10] sm:$0xff] %vm244_vm2, %v243_v22 }
 0x239   :  { %390 = shalt.err (!%p387_p10)
}
 0x23a   :  { %255 = dma.vmem_to_hbm [thread:$0]  %s253_s14, 128, %s469_s5, [#allocation4]  }
 0x23b   :  { %405 = dma.done.wait [#allocation4], 128  }
 0x23c   :  { %406 = vsyncadd [#allocation4], 4294967168 }
 0x23d   :  { %259 = vsyncpa [#allocation3], 1 }
 0x23e   :  { %260 = vsyncpa [#allocation6], 1 }
 0x23f   :  { %261 = vsyncpa [#allocation9], 1 }
 0x240   :  { %262 = vsyncpa [#allocation4], 1 }

// kernel: tpu_custom_call.1
= control target key start
LH: loop header
LB: loop body
LE: loop exit
PB: predicated region body
PF: predicated region fallthrough
CT: control target
= control target key end

     0   :  { %10 = vsyncpa [#allocation3], 0  ;;  %s464_s0 = inlined_call_operand.hbm [shape: f32[8,16], index: 0, kind: input, shape index: {}]   ;;  %s465_s1 = inlined_call_operand.hbm [shape: f32[8,16], index: 1, kind: input, shape index: {}]   ;;  %s466_s2 = inlined_call_operand.hbm [shape: f32[16,128], index: 2, kind: input, shape index: {}]   ;;  %s467_s3 = inlined_call_operand.hbm [shape: f32[16,128], index: 3, kind: input, shape index: {}]   ;;  %s468_s4 = inlined_call_operand.vmem [shape: f32[1,128], index: 4, kind: input, shape index: {}]   ;;  %s469_s5 = inlined_call_operand.hbm [shape: f32[8,32], index: 5, kind: output, shape index: {}]  }
   0x1   :  { %11 = vsyncpa [#allocation6], 0 }
   0x2   :  { %12 = vsyncpa [#allocation9], 0 }
   0x3   :  { %13 = vsyncpa [#allocation4], 0  ;;  %s407_s18 = smov [#allocation5]   ;;  %s408_s20 = smov [#allocation2]  }
   0x4   :  { %s30_s19 = sshll.u32 %s407_s18, 4  ;;  %s20_s21 = sshll.u32 %s408_s20, 4  ;;  %s31_s19 = int_to_ptr.vmem [resolvable:$true] %s30_s19  ;;  %s21_s21 = int_to_ptr.vmem [resolvable:$true] %s20_s21 }
   0x5   :  { %s307_s22 = scalar_lea.vmem %s31_s19, 128  ;;  %p312_p1 = scmp.lt.s32.totalorder %s31_s19, %s31_s19 }
   0x6   :  { %p308_p0 = scmp.ne.s32.totalorder %s31_s19, %s307_s22  ;;  %p313_p2 = scmp.lt.s32.totalorder %s307_s22, %s307_s22 }
   0x8   :  { %p314_p3 = por %p313_p2, %p312_p1 }
   0xa   :  { %p315_p4 = pnand %p314_p3, %p308_p0 }
   0xc   :  { %318 = shalt.err (!%p315_p4)
}
   0xd   :  { %33 = dma.hbm_to_vmem [thread:$0]  %s465_s1, 128, %s31_s19, [#allocation6]  }
   0xe   :  { %s327_s25 = scalar_lea.vmem %s21_s21, 128  ;;  %p332_p6 = scmp.lt.s32.totalorder %s21_s21, %s21_s21 }
   0xf   :  { %p328_p5 = scmp.ne.s32.totalorder %s21_s21, %s327_s25  ;;  %p333_p7 = scmp.lt.s32.totalorder %s327_s25, %s327_s25 }
  0x11   :  { %p334_p8 = por %p333_p7, %p332_p6 }
  0x13   :  { %p335_p9 = pnand %p334_p8, %p328_p5 }
  0x15   :  { %338 = shalt.err (!%p335_p9)
}
  0x16   :  { %23 = dma.hbm_to_vmem [thread:$0]  %s464_s0, 128, %s21_s21, [#allocation3]  }
  0x17   :  { %s409_s28 = smov [#allocation7]  }
  0x18   :  { %s39_s29 = sshll.u32 %s409_s28, 4  ;;  %s40_s29 = int_to_ptr.vmem [resolvable:$true] %s39_s29 }
  0x19   :  { %s347_s30 = scalar_lea.vmem %s40_s29, 256  ;;  %p352_p11 = scmp.lt.s32.totalorder %s40_s29, %s40_s29 }
  0x1a   :  { %p348_p10 = scmp.ne.s32.totalorder %s40_s29, %s347_s30  ;;  %p353_p12 = scmp.lt.s32.totalorder %s347_s30, %s347_s30 }
  0x1c   :  { %p354_p13 = por %p353_p12, %p352_p11 }
  0x1e   :  { %p355_p0 = pnand %p354_p13, %p348_p10 }
  0x20   :  { %358 = shalt.err (!%p355_p0)
}
  0x21   :  { %s410_s1 = smov 128   ;;  %s411_s6 = smov 8  }
  0x22   :  { %45 = dma.hbm_to_vmem [thread:$0]  %s466_s2, 256, %s40_s29, [#allocation6], %s410_s1, %s410_s1, %s411_s6  }
  0x23   :  { %s412_s9 = smov [#allocation8]  }
  0x24   :  { %s51_s10 = sshll.u32 %s412_s9, 4  ;;  %s52_s10 = int_to_ptr.vmem [resolvable:$true] %s51_s10 }
  0x25   :  { %s367_s0 = scalar_lea.vmem %s52_s10, 256  ;;  %p372_p2 = scmp.lt.s32.totalorder %s52_s10, %s52_s10 }
  0x26   :  { %p368_p1 = scmp.ne.s32.totalorder %s52_s10, %s367_s0  ;;  %p373_p3 = scmp.lt.s32.totalorder %s367_s0, %s367_s0 }
  0x28   :  { %p374_p4 = por %p373_p3, %p372_p2 }
  0x2a   :  { %p375_p5 = pnand %p374_p4, %p368_p1 }
  0x2c   :  { %378 = shalt.err (!%p375_p5)
}
  0x2d   :  { %57 = dma.hbm_to_vmem [thread:$0]  %s467_s3, 256, %s52_s10, [#allocation9], %s410_s1, %s410_s1, %s411_s6  }
  0x2e   :  { %399 = dma.done.wait [#allocation3], 128  }
  0x2f   :  { %400 = vsyncadd [#allocation3], 4294967168 }
  0x30   :  { %401 = dma.done.wait [#allocation6], 384  }
  0x31   :  { %402 = vsyncadd [#allocation6], 4294966912 }
  0x32   :  { %403 = dma.done.wait [#allocation9], 256  }
  0x33   :  { %404 = vsyncadd [#allocation9], 4294967040  ;;  %v413_v0 = vmov 0.0   ;;  %vm414_vm0 = vmmov 0   ;;  %v77_v1 = vld [vmem:[#allocation8 + $0x8] sm:$0xff]  ;;  %v75_v2 = vld [vmem:[#allocation7 + $0x8] sm:$0xff] }
  0x34   :  { %272 = vmatprep.subr.mxu0 %v413_v0  ;;  %279 = vmatprep.subr.mxu1 %v413_v0  ;;  %v76_v3 = vld [vmem:[#allocation8] sm:$0xff]  ;;  %v74_v4 = vld [vmem:[#allocation7] sm:$0xff]  ;;  %v73_v5 = vld [vmem:[#allocation5] sm:$0xff]  ;;  %vm78_vm1 = vcmask 130048   ;;  %s415_s13 = smov [#allocation10]   ;;  %vm244_vm2 = vcmask 261120  }
  0x35   :  { %276 = vmatprep.mubr.msk.f32.mxu0 %vm414_vm0, %v413_v0  ;;  %283 = vmatprep.mubr.msk.f32.mxu1 %vm414_vm0, %v413_v0  ;;  %v72_v6 = vld [vmem:[#allocation2] sm:$0xff]  ;;  %s252_s14 = sshll.u32 %s415_s13, 4  ;;  %s253_s14 = int_to_ptr.vmem [resolvable:$true] %s252_s14 }
  0x36   :  { %273 = vmatpush3.msra.mxu0 %v77_v1  ;;  %280 = vmatpush3.msra.mxu1 %v75_v2  ;;  %v265_v9 = vld [vmem:[%s468_s4] ss:$0 sm:$0xff]  ;;  %s379_s4 = scalar_lea.vmem %s253_s14, 128  ;;  %p384_p7 = scmp.lt.s32.totalorder %s253_s14, %s253_s14 }
  0x37   :  { %274 = vmatprep.subr.mxu0 %v413_v0  ;;  %281 = vmatprep.subr.mxu1 %v413_v0  ;;  %p380_p6 = scmp.ne.s32.totalorder %s253_s14, %s379_s4  ;;  %p385_p8 = scmp.lt.s32.totalorder %s379_s4, %s379_s4 }
  0x38   :  { %275 = vmatpush3.msra.mxu0 %v76_v3  ;;  %282 = vmatpush3.msra.mxu1 %v74_v4 }
  0x39   :  { %277 = vmatmul.mubr.msk.f32.vlgmr.msra.gmra.mxu0 %vm78_vm1, %v73_v5  ;;  %284 = vmatmul.mubr.msk.f32.vlgmr.msra.gmra.mxu1 %vm78_vm1, %v72_v6  ;;  %p386_p9 = por %p385_p8, %p384_p7 }
  0x3b   :  { %p387_p10 = pnand %p386_p9, %p380_p6 }
  0xf9   :  { %v148_v7 = vpop.f32.mrf.mxu0  ;;  %v221_v8 = vpop.f32.mrf.mxu1 }
  0xfa   :  { %v222_v10 = vadd.f32 %v221_v8, %v148_v7 }
  0xfb   :  { %v278_v11 = vpop.f32.mrf.mxu0  ;;  %v285_v12 = vpop.f32.mrf.mxu1 }
  0xfc   :  { %v232_v13 = vadd.f32 %v265_v9, %v222_v10 }
  0xfe   :  { %v233_v14 = vmul.f32 0.01, %v232_v13 }
 0x100   :  { %v234_v15 = vmax.f32 %v232_v13, %v233_v14 }
 0x102   :  { %235 = vmax.xlane.f32.xlu0 %v234_v15 }
 0x18b   :  { %v236_v16 = vpop.xlane.xlu0 %235 }
 0x18c   :  { %v237_v17 = vsub.f32 %v234_v15, %v236_v16 }
 0x18e   :  { %v238_v18 = vmul.f32 1.442695, %v237_v17 }
 0x190   :  { %295 = vpow2.f32 %v238_v18 }
 0x19d   :  { %v296_v19 = vpop.eup %295 }
 0x19e   :  { %240 = vadd.xlane.f32.xlu0 %v296_v19 }
 0x227   :  { %v241_v20 = vpop.xlane.xlu0 %240 }
 0x228   :  { %297 = vrcp.f32 %v241_v20 }
 0x235   :  { %v298_v21 = vpop.eup %297 }
 0x236   :  { %v243_v22 = vmul.f32 %v298_v21, %v296_v19 }
 0x238   :  { %245 = vst.msk [vmem:[#allocation10] sm:$0xff] %vm244_vm2, %v243_v22 }
 0x239   :  { %390 = shalt.err (!%p387_p10)
}
 0x23a   :  { %255 = dma.vmem_to_hbm [thread:$0]  %s253_s14, 128, %s469_s5, [#allocation4]  }
 0x23b   :  { %405 = dma.done.wait [#allocation4], 128  }
 0x23c   :  { %406 = vsyncadd [#allocation4], 4294967168 }
 0x23d   :  { %259 = vsyncpa [#allocation3], 1 }
 0x23e   :  { %260 = vsyncpa [#allocation6], 1 }
 0x23f   :  { %261 = vsyncpa [#allocation9], 1 }
 0x240   :  { %262 = vsyncpa [#allocation4], 1 }

</bundles_post_ra>
